<compile_context>
chip_gen: v7x
topology: tpu7x:2x2x1
jax: 0.10.0
libtpu: 0.0.40
codegen_flags: <defaults>
</compile_context>

<pallas_src>
import functools

import jax
import jax.numpy as jnp
from jax.experimental import pallas as pl
from jax.experimental.pallas import tpu as pltpu


def _vmem_ceiling_bytes():
    """3/4 of per-core VMEM (v7x: ~48 MiB; v5e/v6e: ~96 MiB), with fallback."""
    try:
        cap = int(pltpu.get_tpu_info().vmem_capacity_bytes)
    except Exception:
        cap = 64 * 1024 * 1024
    return (cap * 3) // 4


def _conv3x3_head_kernel(x_ref, w_ref, b_ref, o_ref, lhs_ref, *,
                         H, W, valid_cols, padded_out):
    """One (image, Cout-tile) grid step.

    x_ref:   (1, H, W, Cin)       NHWC activations (compute dtype), unpadded
    w_ref:   (KP, COUT_TILE)      im2col weight slab for this Cout tile
    b_ref:   (1, COUT_TILE)       bias (f32) for this Cout tile
    o_ref:   (1, H*W, COUT_TILE)  if padded_out else (1, H*W, Cout)
    lhs_ref: (H*W, KP)            VMEM scratch: im2col slab, built once/image
    """
    j = pl.program_id(1)

    # Build the im2col slab ONCE per image; reused across all Cout tiles.
    # The Cout grid axis is "arbitrary", so every core that owns this image
    # executes j == 0 before the other Cout tiles.
    @pl.when(j == 0)
    def _():
        x = x_ref[0]                                    # (H, W, Cin)
        Cin = x.shape[-1]
        # Zero-pad H and W by 1 on each side, entirely in VMEM/vregs.
        zh = jnp.zeros((1, W, Cin), x.dtype)
        xp = jnp.concatenate([zh, x, zh], axis=0)       # (H+2, W, Cin)
        zw = jnp.zeros((H + 2, 1, Cin), x.dtype)
        xp = jnp.concatenate([zw, xp, zw], axis=1)      # (H+2, W+2, Cin)
        taps = [xp[dh:dh + H, dw:dw + W, :]
                for dh in range(3) for dw in range(3)]
        K = 9 * Cin
        KP = lhs_ref.shape[-1]
        if KP > K:                                      # static K padding
            taps.append(jnp.zeros((H, W, KP - K), x.dtype))
        lhs_ref[...] = jnp.concatenate(taps, axis=-1).reshape(H * W, KP)

    acc = jnp.dot(lhs_ref[...], w_ref[...],
                  preferred_element_type=jnp.float32) + b_ref[...]
    if padded_out:
        o_ref[0] = acc.astype(o_ref.dtype)
    else:
        o_ref[0] = acc[:, :valid_cols].astype(o_ref.dtype)


def prepare_level_params(w_oihw, bias, *, cout_tile=None,
                         compute_dtype=jnp.bfloat16):
    """One-time (model-init) weight transform for one conv level."""
    Cout, Cin, KH, KW = w_oihw.shape
    assert (KH, KW) == (3, 3), "SSD scoring heads use 3x3 convs"
    if cout_tile is None:
        # 256-wide Cout tiles only when needed (v6e/v7x MXU width), else 128.
        # TODO(synk): pick 128 on v5e (4x128x128 MXUs) via a hardware query.
        cout_tile = 128 if Cout <= 128 else 256
    itemsize = jnp.dtype(compute_dtype).itemsize
    k_align = 32 // itemsize          # sublane packing: f32 -> 8, bf16 -> 16
    K = 9 * Cin
    KP = pl.cdiv(K, k_align) * k_align
    cout_pad = pl.cdiv(Cout, cout_tile) * cout_tile

    # (Cout, Cin, 3, 3) -> row index (kh*3 + kw)*Cin + ci, col index co.
    w_mat = jnp.transpose(w_oihw, (2, 3, 1, 0)).reshape(K, Cout)
    w_mat = jnp.pad(w_mat, ((0, KP - K), (0, cout_pad - Cout)))
    w_mat = w_mat.astype(compute_dtype)
    b_mat = jnp.pad(bias.astype(jnp.float32),
                    (0, cout_pad - Cout)).reshape(1, cout_pad)
    return dict(w_mat=w_mat, b_mat=b_mat, cout=Cout, cin=Cin, kp=KP,
                cout_tile=cout_tile, cout_pad=cout_pad,
                compute_dtype=compute_dtype)


def conv3x3_head_level(x_nchw, prep, num_columns):
    """3x3/pad=1/stride=1 conv + SSD head reshape for one feature level."""
    N, Cin, H, W = x_nchw.shape
    assert Cin == prep["cin"]
    Cout = prep["cout"]
    cout_tile = prep["cout_tile"]
    cout_pad = prep["cout_pad"]
    KP = prep["kp"]
    cdt = prep["compute_dtype"]
    A = Cout // num_columns
    M = H * W
    n_cout_tiles = cout_pad // cout_tile
    padded_out = n_cout_tiles > 1
    out_dtype = x_nchw.dtype
    out_cols = cout_pad if padded_out else Cout

    # Only per-forward wrapper op: NCHW -> NHWC (+ cast to compute dtype).
    x_nhwc = jnp.transpose(x_nchw, (0, 2, 3, 1)).astype(cdt)

    kernel = functools.partial(_conv3x3_head_kernel, H=H, W=W,
                               valid_cols=Cout, padded_out=padded_out)

    if padded_out:
        out_spec = pl.BlockSpec((1, M, cout_tile), lambda n, j: (n, 0, j))
    else:
        # Tiny-Cout head: store only the valid columns (full-dim last block).
        out_spec = pl.BlockSpec((1, M, Cout), lambda n, j: (n, 0, 0))

    # VMEM budget derived from tile sizes (2x slack), capped under capacity.
    cbytes = jnp.dtype(cdt).itemsize
    obytes = jnp.dtype(out_dtype).itemsize
    est = (M * KP * cbytes                  # im2col scratch
           + 2 * H * W * Cin * cbytes       # double-buffered activation block
           + 2 * KP * cout_tile * cbytes    # double-buffered weight block
           + 2 * cout_tile * 4              # bias block
           + 2 * M * out_cols * obytes)     # double-buffered output block
    vmem_limit = int(min(_vmem_ceiling_bytes(),
                         max(16 * 1024 * 1024, 2 * est)))

    out = pl.pallas_call(
        kernel,
        out_shape=jax.ShapeDtypeStruct((N, M, out_cols), out_dtype),
        grid=(N, n_cout_tiles),
        in_specs=[
            pl.BlockSpec((1, H, W, Cin), lambda n, j: (n, 0, 0, 0)),
            pl.BlockSpec((KP, cout_tile), lambda n, j: (0, j)),
            pl.BlockSpec((1, cout_tile), lambda n, j: (0, j)),
        ],
        out_specs=out_spec,
        scratch_shapes=[pltpu.VMEM((M, KP), cdt)],
        compiler_params=pltpu.CompilerParams(
            # Batch axis parallel (megacore on v7x). Cout axis MUST be
            # "arbitrary": the im2col scratch is built at j == 0.
            dimension_semantics=("parallel", "arbitrary"),
            vmem_limit_bytes=vmem_limit,
        ),
    )(x_nhwc, prep["w_mat"], prep["b_mat"])

    if padded_out:
        out = out[:, :, :Cout]      # drop lane padding (class-head path only)
    # In NHWC, channel index a*C + c at pixel (n, h, w) makes the PyTorch
    # view/permute/reshape a plain row-major reshape.
    return out.reshape(N, M * A, num_columns)


def prepare_scoring_head(params, *, cout_tile=None,
                         compute_dtype=jnp.bfloat16):
    """params: list of (weight_OIHW, bias). Call once at model init."""
    return [prepare_level_params(w, b, cout_tile=cout_tile,
                                 compute_dtype=compute_dtype)
            for (w, b) in params]


def ssd_scoring_head(features, prepared_params, num_columns):
    """features: list of NCHW arrays; prepared_params: prepare_scoring_head."""
    all_results = [conv3x3_head_level(x, prep, num_columns)
                   for x, prep in zip(features, prepared_params)]
    return jnp.concatenate(all_results, axis=1)


def _reference(features, params, num_columns):
    """Pure-JAX reference mirroring the PyTorch forward (f32)."""
    outs = []
    for x, (w, b) in zip(features, params):
        y = jax.lax.conv_general_dilated(
            x, w, window_strides=(1, 1), padding=((1, 1), (1, 1)),
            dimension_numbers=("NCHW", "OIHW", "NCHW"))
        y = y + b[None, :, None, None]
        N, C_all, H, W = y.shape
        A = C_all // num_columns
        y = y.reshape(N, A, num_columns, H, W)
        y = jnp.transpose(y, (0, 3, 4, 1, 2))
        outs.append(y.reshape(N, -1, num_columns))
    return jnp.concatenate(outs, axis=1)


if __name__ == "__main__":
    key = jax.random.PRNGKey(0)

    def make_head(key, level_cfg, num_columns):
        features, params = [], []
        for cfg in level_cfg:
            key, kx, kw, kb = jax.random.split(key, 4)
            cout = cfg["num_anchors"] * num_columns
            features.append(jax.random.normal(
                kx, (2, cfg["cin"], cfg["hw"], cfg["hw"]), jnp.float32))
            w = jax.random.normal(
                kw, (cout, cfg["cin"], 3, 3), jnp.float32) * 0.05
            b = jax.random.normal(kb, (cout,), jnp.float32) * 0.05
            params.append((w, b))
        return key, features, params

    # --- Regression-style head: tiny Cout (16 / 24) -> unpadded-output path.
    num_columns = 4
    key, features, params = make_head(
        key, [dict(cin=8, hw=8, num_anchors=4),
              dict(cin=16, hw=4, num_anchors=6)], num_columns)
    ref = jax.block_until_ready(_reference(features, params, num_columns))

    prep_f32 = prepare_scoring_head(params, compute_dtype=jnp.float32)
    out_f32 = jax.block_until_ready(
        ssd_scoring_head(features, prep_f32, num_columns))
    assert out_f32.shape == ref.shape, (out_f32.shape, ref.shape)
    assert jnp.allclose(out_f32, ref, atol=1e-4, rtol=1e-4), float(
        jnp.max(jnp.abs(out_f32 - ref)))

    prep_bf16 = prepare_scoring_head(params, compute_dtype=jnp.bfloat16)
    out_bf16 = jax.block_until_ready(
        ssd_scoring_head(features, prep_bf16, num_columns))
    assert out_bf16.shape == ref.shape, (out_bf16.shape, ref.shape)
    assert jnp.allclose(out_bf16, ref, atol=3e-2, rtol=3e-2), float(
        jnp.max(jnp.abs(out_bf16 - ref)))

    # --- Classification-style head: Cout = 7 * 21 = 147, forced 128-lane Cout
    # tiles -> exercises the multi-tile grid, the pl.when-hoisted im2col
    # scratch reuse, and the lane-dense padded-writeback path.
    num_columns_cls = 21
    key, feats_cls, params_cls = make_head(
        key, [dict(cin=8, hw=8, num_anchors=7),
              dict(cin=16, hw=4, num_anchors=7)], num_columns_cls)
    ref_cls = jax.block_until_ready(
        _reference(feats_cls, params_cls, num_columns_cls))

    prep_cls_f32 = prepare_scoring_head(params_cls, cout_tile=128,
                                        compute_dtype=jnp.float32)
    out_cls_f32 = jax.block_until_ready(
        ssd_scoring_head(feats_cls, prep_cls_f32, num_columns_cls))
    assert out_cls_f32.shape == ref_cls.shape, (out_cls_f32.shape,
                                                ref_cls.shape)
    assert jnp.allclose(out_cls_f32, ref_cls, atol=1e-4, rtol=1e-4), float(
        jnp.max(jnp.abs(out_cls_f32 - ref_cls)))

    prep_cls_bf16 = prepare_scoring_head(params_cls, cout_tile=128,
                                         compute_dtype=jnp.bfloat16)
    out_cls_bf16 = jax.block_until_ready(
        ssd_scoring_head(feats_cls, prep_cls_bf16, num_columns_cls))
    assert jnp.allclose(out_cls_bf16, ref_cls, atol=3e-2, rtol=3e-2), float(
        jnp.max(jnp.abs(out_cls_bf16 - ref_cls)))

    print("KERNEL_OK")
</pallas_src>

<mosaic_0001>
module attributes {stable_mosaic.version = 11 : i64} {
  func.func @_conv3x3_head_kernel(%arg0: i32, %arg1: i32, %arg2: memref<1x8x8x8xf32, #tpu.memory_space<vmem>>, %arg3: memref<72x128xf32, #tpu.memory_space<vmem>>, %arg4: memref<1x128xf32, #tpu.memory_space<vmem>>, %arg5: memref<1x64x16xf32, #tpu.memory_space<vmem>>, %arg6: memref<64x72xf32, #tpu.memory_space<vmem>>) attributes {dimension_semantics = [#tpu.dimension_semantics<parallel>, #tpu.dimension_semantics<arbitrary>], iteration_bounds = array<i64: 2, 1>, scalar_prefetch = 0 : i64, scratch_operands = 1 : i64, tpu.core_type = #tpu.core_type<tc>, window_params = [{transform_indices = @transform_0, window_bounds = array<i64: 1, 8, 8, 8>}, {transform_indices = @transform_1, window_bounds = array<i64: 72, 128>}, {transform_indices = @transform_2, window_bounds = array<i64: 1, 128>}, {transform_indices = @transform_3, window_bounds = array<i64: 1, 64, 16>}]} {
    %c0_i32 = arith.constant 0 : i32
    %0 = arith.cmpi eq, %arg1, %c0_i32 : i32
    %1 = arith.extui %0 : i1 to i32
    %c0_i32_0 = arith.constant 0 : i32
    %2 = arith.cmpi ne, %1, %c0_i32_0 : i32
    scf.if %2 {
      %c0_9 = arith.constant 0 : index
      %c0_10 = arith.constant 0 : index
      %c0_11 = arith.constant 0 : index
      %c0_12 = arith.constant 0 : index
      %13 = vector.load %arg2[%c0_9, %c0_10, %c0_11, %c0_12] : memref<1x8x8x8xf32, #tpu.memory_space<vmem>>, vector<1x8x8x8xf32>
      %14 = vector.shape_cast %13 : vector<1x8x8x8xf32> to vector<8x8x8xf32>
      %cst_13 = arith.constant 0.000000e+00 : f32
      %15 = vector.broadcast %cst_13 : f32 to vector<1x8x8xf32>
      %16 = tpu.concatenate %15, %14, %15 in 0 : vector<1x8x8xf32>, vector<8x8x8xf32>, vector<1x8x8xf32> -> vector<10x8x8xf32>
      %cst_14 = arith.constant 0.000000e+00 : f32
      %17 = vector.broadcast %cst_14 : f32 to vector<10x1x8xf32>
      %18 = tpu.concatenate %17, %16, %17 in 1 : vector<10x1x8xf32>, vector<10x8x8xf32>, vector<10x1x8xf32> -> vector<10x10x8xf32>
      %19 = vector.extract_strided_slice %18 {offsets = [0, 0, 0], sizes = [8, 8, 8], strides = [1, 1, 1]} : vector<10x10x8xf32> to vector<8x8x8xf32>
      %20 = vector.extract_strided_slice %18 {offsets = [0, 1, 0], sizes = [8, 8, 8], strides = [1, 1, 1]} : vector<10x10x8xf32> to vector<8x8x8xf32>
      %21 = vector.extract_strided_slice %18 {offsets = [0, 2, 0], sizes = [8, 8, 8], strides = [1, 1, 1]} : vector<10x10x8xf32> to vector<8x8x8xf32>
      %22 = vector.extract_strided_slice %18 {offsets = [1, 0, 0], sizes = [8, 8, 8], strides = [1, 1, 1]} : vector<10x10x8xf32> to vector<8x8x8xf32>
      %23 = vector.extract_strided_slice %18 {offsets = [1, 1, 0], sizes = [8, 8, 8], strides = [1, 1, 1]} : vector<10x10x8xf32> to vector<8x8x8xf32>
      %24 = vector.extract_strided_slice %18 {offsets = [1, 2, 0], sizes = [8, 8, 8], strides = [1, 1, 1]} : vector<10x10x8xf32> to vector<8x8x8xf32>
      %25 = vector.extract_strided_slice %18 {offsets = [2, 0, 0], sizes = [8, 8, 8], strides = [1, 1, 1]} : vector<10x10x8xf32> to vector<8x8x8xf32>
      %26 = vector.extract_strided_slice %18 {offsets = [2, 1, 0], sizes = [8, 8, 8], strides = [1, 1, 1]} : vector<10x10x8xf32> to vector<8x8x8xf32>
      %27 = vector.extract_strided_slice %18 {offsets = [2, 2, 0], sizes = [8, 8, 8], strides = [1, 1, 1]} : vector<10x10x8xf32> to vector<8x8x8xf32>
      %28 = tpu.concatenate %19, %20, %21, %22, %23, %24, %25, %26, %27 in 2 : vector<8x8x8xf32>, vector<8x8x8xf32>, vector<8x8x8xf32>, vector<8x8x8xf32>, vector<8x8x8xf32>, vector<8x8x8xf32>, vector<8x8x8xf32>, vector<8x8x8xf32>, vector<8x8x8xf32> -> vector<8x8x72xf32>
      %29 = vector.shape_cast %28 : vector<8x8x72xf32> to vector<64x72xf32>
      %c0_15 = arith.constant 0 : index
      %c0_16 = arith.constant 0 : index
      %30 = vector.load %arg6[%c0_15, %c0_16] : memref<64x72xf32, #tpu.memory_space<vmem>>, vector<64x72xf32>
      tpu.vector_store %arg6[%c0_15, %c0_16], %29 {strides = array<i32>} : memref<64x72xf32, #tpu.memory_space<vmem>>, vector<64x72xf32>,
    } else {
    }
    %c0 = arith.constant 0 : index
    %c0_1 = arith.constant 0 : index
    %3 = vector.load %arg6[%c0, %c0_1] : memref<64x72xf32, #tpu.memory_space<vmem>>, vector<64x72xf32>
    %c0_2 = arith.constant 0 : index
    %c0_3 = arith.constant 0 : index
    %4 = vector.load %arg3[%c0_2, %c0_3] : memref<72x128xf32, #tpu.memory_space<vmem>>, vector<72x128xf32>
    %cst = arith.constant dense<0.000000e+00> : vector<64x128xf32>
    %5 = tpu.matmul %3, %4, %cst {dimension_numbers = #tpu.dot_dimension_numbers<[1], [0], [0], [1], [0, 0, 1, 1], [], []>} : vector<64x72xf32>, vector<72x128xf32>, vector<64x128xf32> -> vector<64x128xf32>
    %c0_4 = arith.constant 0 : index
    %c0_5 = arith.constant 0 : index
    %6 = vector.load %arg4[%c0_4, %c0_5] : memref<1x128xf32, #tpu.memory_space<vmem>>, vector<1x128xf32>
    %7 = vector.broadcast %6 : vector<1x128xf32> to vector<64x128xf32>
    %8 = arith.addf %5, %7 : vector<64x128xf32>
    %9 = vector.extract_strided_slice %8 {offsets = [0, 0], sizes = [64, 16], strides = [1, 1]} : vector<64x128xf32> to vector<64x16xf32>
    %c0_6 = arith.constant 0 : index
    %c0_7 = arith.constant 0 : index
    %c0_8 = arith.constant 0 : index
    %10 = vector.load %arg5[%c0_6, %c0_7, %c0_8] : memref<1x64x16xf32, #tpu.memory_space<vmem>>, vector<1x64x16xf32>
    %11 = vector.shape_cast %10 : vector<1x64x16xf32> to vector<64x16xf32>
    %12 = vector.shape_cast %9 : vector<64x16xf32> to vector<1x64x16xf32>
    tpu.vector_store %arg5[%c0_6, %c0_7, %c0_8], %12 {strides = array<i32>} : memref<1x64x16xf32, #tpu.memory_space<vmem>>, vector<1x64x16xf32>,
    return
  }
  func.func @transform_0(%arg0: i32, %arg1: i32) -> (i32, i32, i32, i32) {
    %c0_i32 = arith.constant 0 : i32
    %c0_i32_0 = arith.constant 0 : i32
    %c0_i32_1 = arith.constant 0 : i32
    %c0_i32_2 = arith.constant 0 : i32
    return %arg0, %c0_i32, %c0_i32_0, %c0_i32_1 : i32, i32, i32, i32
  }
  func.func @transform_1(%arg0: i32, %arg1: i32) -> (i32, i32) {
    %c0_i32 = arith.constant 0 : i32
    %c0_i32_0 = arith.constant 0 : i32
    return %c0_i32, %arg1 : i32, i32
  }
  func.func @transform_2(%arg0: i32, %arg1: i32) -> (i32, i32) {
    %c0_i32 = arith.constant 0 : i32
    %c0_i32_0 = arith.constant 0 : i32
    return %c0_i32, %arg1 : i32, i32
  }
  func.func @transform_3(%arg0: i32, %arg1: i32) -> (i32, i32, i32) {
    %c0_i32 = arith.constant 0 : i32
    %c0_i32_0 = arith.constant 0 : i32
    %c0_i32_1 = arith.constant 0 : i32
    return %arg0, %c0_i32, %c0_i32_0 : i32, i32, i32
  }
}

</mosaic_0001>

<bundles_post_ra>
// kernel: tpu_custom_call.1
= control target key start
LH: loop header
LB: loop body
LE: loop exit
PB: predicated region body
PF: predicated region fallthrough
CT: control target
= control target key end

     0   :  { %8 = vsyncpa [#allocation4], 0  ;;  %s1733_s0 = inlined_call_operand.hbm [shape: f32[2,8,8,8], index: 0, kind: input, shape index: {}]   ;;  %s1734_s1 = inlined_call_operand.hbm [shape: f32[72,128], index: 1, kind: input, shape index: {}]   ;;  %s1735_s2 = inlined_call_operand.vmem [shape: f32[1,128], index: 2, kind: input, shape index: {}]   ;;  %s1736_s3 = inlined_call_operand.vmem [shape: f32[2,64,16], index: 3, kind: output, shape index: {}]  }
   0x1   :  { %10 = vsyncpa [#allocation4 + $0x1], 0 }
   0x2   :  { %11 = vsyncpa [#allocation6], 0  ;;  %s1230_s12 = smov 0   ;;  %s1232_s13 = smov 0  }
   0x3   :  { %s1234_s14 = smov 0   ;;  %s1236_s15 = smov 0  }
   0x4   :  { %s1238_s16 = smov 0   ;;  %s1240_s17 = smov 0  }
   0x5 LB: > { %s906_s18 = sadd.s32 4294967295, %s1195_s17   ;;  %p49_p0 = scmp.ne.s32.totalorder %s1179_s13, %s1175_s12  ;;  %s1195_s17 = sphi %s1240_s17, %s17_s17   ;;  %s1191_s16 = sphi %s1238_s16, %s1753_s16   ;;  %s1187_s15 = sphi %s1236_s15, %s1752_s15   ;;  %s1183_s14 = sphi %s1234_s14, %s1751_s14   ;;  %s1179_s13 = sphi %s1232_s13, %s1750_s13   ;;  %s1175_s12 = sphi %s1230_s12, %s1749_s12  }
   0x6   : > { %p1260_p1 = scmp.eq.s32.totalorder %s906_s18, 0  ;;  %p908_p2 = scmp.ge.s32.totalorder %s1195_s17, 1 }
   0x7   : > { %p138_p3 = scmp.lt.s32.totalorder %s1195_s17, 3  ;;  %s1197_s22 = smov [#allocation5]  }
   0x8   : > { %s1741_s19 = scalar_select %p1260_p1, 1, 0 }
   0x9   : > { %p1268_p4 = por %p1260_p1, %p49_p0  ;;  %p1272_p5 = pnand %p908_p2, %p138_p3 }
   0xa   : > { %s152_s23 = sshll.u32 %s1197_s22, 4  ;;  %s29_s25 = sadd.s32 1, %s1191_s16  ;;  %s153_s23 = int_to_ptr.vmem [resolvable:$true] %s152_s23 }
   0xb   : > { %s1742_s20 = scalar_select %p1268_p4, 1, 0 }
   0xc   : > { %s1743_s21 = scalar_select %p1272_p5, 1, 0 }
   0xd   : > { %p1012_p6 = pneg %p1272_p5  ;;  %s1083_s28 = scalar_lea.hbm %s1734_s1, 1152 }
   0xe   : > { %p1084_p8 = scmp.ne.s32.totalorder %s1734_s1, %s1083_s28  ;;  %p1090_p12 = scmp.lt.u32.totalorder %s1083_s28, %s1734_s1 }
   0xf   : > { %p1280_p7 = pnand %p1012_p6, %p1260_p1 }
  0x11   : > { %p1085_p9 = pneg %p1280_p7 }
  0x13   : > { %p1086_p10 = pnand %p1085_p9, %p1084_p8 }
  0x15   : > { %p1087_p11 = pneg %p1086_p10 }
  0x17   : > { %p1092_p13 = pnand %p1090_p12, %p1087_p11 }
  0x19   : > { %1095 = shalt.err (!%p1092_p13)
}
  0x1a   : > { %s1096_s6 = scalar_lea.vmem %s153_s23, 1152  ;;  %p1104_p6 = scmp.lt.s32.totalorder %s153_s23, %s153_s23 }
  0x1b   : > { %p1097_p0 = scmp.ne.s32.totalorder %s153_s23, %s1096_s6  ;;  %p1105_p1 = scmp.lt.s32.totalorder %s1096_s6, %s1096_s6 }
  0x1d   : > { %p1099_p2 = pnand %p1097_p0, %p1085_p9  ;;  %p1106_p4 = por %p1105_p1, %p1104_p6 }
  0x1f   : > { %p1100_p3 = pneg %p1099_p2 }
  0x21   : > { %p1107_p5 = pnand %p1106_p4, %p1100_p3 }
  0x23   : > { %1110 = shalt.err (!%p1107_p5)
}
  0x24   : > { %s1198_s7 = smov 128   ;;  %s1199_s8 = smov 8  }
  0x25   : > { %1015 = dma.hbm_to_vmem [thread:$0]  (!%p1280_p7), %s1734_s1, 1152, %s153_s23, [#allocation6], %s1198_s7, %s1198_s7, %s1199_s8  }
  0x26   : > { %p31_p1 = scmp.ge.s32.totalorder %s29_s25, 2  ;;  %s36_s11 = sadd.s32 1, %s1183_s14 }
  0x27   : > { %p43_p4 = scmp.ne.s32.totalorder %s1183_s14, %s1179_s13  ;;  %p44_p5 = scmp.eq.s32.totalorder %s1195_s17, 0 }
  0x28   : > { %s1755_s25 = smov (%p31_p1, %s29_s25), 0  ;;  %p1021_p9 = scmp.lt.s32.totalorder %s1195_s17, 2 }
  0x29   : > { %p45_p8 = por %p44_p5, %p43_p4  ;;  %s33_s12 = ssub.s32 %s1191_s16, %s1755_s25 }
  0x2a   : > { %s172_s18 = sand.u32 1, %s1183_s14   ;;  %p34_p10 = scmp.eq.s32.totalorder %s33_s12, 0 }
  0x2b   : > { %s912_s22 = sshll.u32 %s172_s18, 6  ;;  %s931_s24 = sshll.u32 %s1191_s16, 10 }
  0x2c   : > { %s1316_s26 = scalar_select %p34_p10, %s1183_s14, %s36_s11  }
  0x2d   : > { %s1321_s23 = scalar_lea.hbm %s1733_s0, %s931_s24  ;;  %s176_s29 = scalar_lea.vmem [#allocation3], %s912_s22 }
  0x2e   : > { %s183_s30 = sshll.u32 %s176_s29, 4  ;;  %p1323_p7 = pnand %p1021_p9, %p45_p8  ;;  %s1327_s30 = int_to_ptr.vmem [resolvable:$true] %s183_s30 }
  0x2f   : > { %s1329_s5 = scalar_lea.sflag [#allocation4], %s172_s18  ;;  %s1111_s6 = scalar_lea.hbm %s1321_s23, 1024 }
  0x30   : > { %p1112_p11 = scmp.ne.s32.totalorder %s1321_s23, %s1111_s6  ;;  %p1113_p12 = pneg %p1323_p7 }
  0x31   : > { %s1116_s11 = scalar_lea.hbm %s1733_s0, 2048  ;;  %p1117_p2 = scmp.lt.u32.totalorder %s1321_s23, %s1733_s0 }
  0x32   : > { %p1114_p13 = pnand %p1113_p12, %p1112_p11  ;;  %p1118_p3 = scmp.lt.u32.totalorder %s1116_s11, %s1111_s6 }
  0x33   : > { %p1120_p1 = scmp.lt.u32.totalorder %s1111_s6, %s1321_s23 }
  0x34   : > { %p1115_p0 = pneg %p1114_p13  ;;  %p1119_p6 = por %p1118_p3, %p1117_p2 }
  0x36   : > { %p1121_p4 = por %p1120_p1, %p1119_p6 }
  0x38   : > { %p1122_p5 = pnand %p1121_p4, %p1115_p0 }
  0x3a   : > { %1125 = shalt.err (!%p1122_p5)
}
  0x3b   : > { %s1126_s18 = scalar_lea.vmem %s1327_s30, 1024  ;;  %s1200_s24 = smov [#allocation3]  }
  0x3c   : > { %p1127_p8 = scmp.ne.s32.totalorder %s1327_s30, %s1126_s18  ;;  %s1131_s27 = sshll.u32 %s1200_s24, 4  ;;  %s1132_s27 = int_to_ptr.vmem [resolvable:$false] %s1131_s27 }
  0x3d   : > { %s1133_s28 = scalar_lea.vmem %s1132_s27, 2048  ;;  %p1134_p11 = scmp.lt.s32.totalorder %s1327_s30, %s1132_s27 }
  0x3e   : > { %p1129_p9 = pnand %p1127_p8, %p1113_p12  ;;  %p1135_p13 = scmp.lt.s32.totalorder %s1133_s28, %s1126_s18 }
  0x40   : > { %p1130_p10 = pneg %p1129_p9  ;;  %p1136_p2 = por %p1135_p13, %p1134_p11 }
  0x42   : > { %p1137_p3 = pnand %p1136_p2, %p1130_p10 }
  0x44   : > { %1140 = shalt.err (!%p1137_p3)
}
  0x45   : > { %1019 = dma.hbm_to_vmem [thread:$0]  (!%p1323_p7), %s1321_s23, 1024, %s1327_s30, %s1329_s5, %s1198_s7, %s1198_s7, %s1199_s8  }
  0x46   : > { %p1746_p12 = scmp.ne.s32.totalorder %s1743_s21, 0 }
  0x47   : > { %s197_s29 = sand.u32 (!%p1746_p12), 1, %s1179_s13   ;;  %p1747_p0 = scmp.ne.s32.totalorder (!%p1746_p12), %s1742_s20, 0 }
  0x48   : > { %195 = sbr.rel (%p1746_p12) target bundleno = 556 (0x22c), region = 32  ;;  %s916_s6 = sshll.u32 (!%p1746_p12), %s197_s29, 6 }
  0x49   : > { %s198_s9 = scalar_lea.sflag (!%p1746_p12), [#allocation4], %s197_s29  ;;  %s1363_s10 = scalar_lea.vmem (!%p1746_p12), [#allocation3], %s916_s6 }
  0x4f   : > { %1166 = dma.done.wait (%p1747_p0), %s198_s9, 1024  }
  0x50   : > { %1168 = vsyncadd (%p1747_p0), %s198_s9, 4294966272  ;;  %p1748_p6 = scmp.ne.s32.totalorder %s1741_s19, 0 }
  0x52   : > { %1170 = dma.done.wait (%p1748_p6), [#allocation6], 1152  }
  0x53   : > { %1172 = vsyncadd (%p1748_p6), [#allocation6], 4294966144  ;;  %vm278_vm0 = vcmask 1040384   ;;  %v1201_v0 = vmov 0.0   ;;  %vm313_vm1 = vcmask 1046528   ;;  %vm362_vm2 = vcmask 1045504  }
  0x54   : > { %v260_v1 = vrot.slane %v1201_v0, 7  ;;  %s1202_s19 = smov 8   ;;  %v243_v9 = vld [vmem:[%s1363_s10] sm:$0xff]  ;;  %v246_v10 = vld [vmem:[%s1363_s10 + $0x18] sm:$0xff]  ;;  %s1203_s20 = smov 16   ;;  %v244_v36 = vld [vmem:[%s1363_s10 + $0x8] sm:$0xff] }
  0x55   : > { %v247_v11 = vld [vmem:[%s1363_s10 + $0x20] sm:$0xff]  ;;  %v261_v13 = vrot.slane %v243_v9, 7  ;;  %v264_v14 = vrot.slane %v246_v10, 7  ;;  %v250_v37 = vld [vmem:[%s1363_s10 + $0x38] sm:$0xff]  ;;  %v262_v41 = vrot.slane %v244_v36, 7  ;;  %s1204_s21 = smov 24  }
  0x56   : > { %v1374_v2 = vsel %vm278_vm0, 0.0, %v260_v1  ;;  %v288_v3 = vsel %vm278_vm0, %v260_v1, 0.0  ;;  %v265_v15 = vrot.slane %v247_v11, 7  ;;  %v268_v42 = vrot.slane %v250_v37, 7  ;;  %v248_v45 = vld [vmem:[%s1363_s10 + $0x28] sm:$0xff]  ;;  %v245_v58 = vld [vmem:[%s1363_s10 + $0x10] sm:$0xff] }
  0x57   : > { %v314_v4 = vrot.slane %v1374_v2, 1  ;;  %v315_v5 = vrot.slane %v288_v3, 1  ;;  %v363_v6 = vrot.slane %v1374_v2, 2  ;;  %v364_v7 = vrot.slane %v288_v3, 2  ;;  %s1205_s7 = smov 32   ;;  %s1206_s8 = smov 40  }
  0x58   : > { %v1391_v16 = vsel %vm278_vm0, 0.0, %v261_v13  ;;  %v289_v17 = vsel %vm278_vm0, %v261_v13, 0.0  ;;  %v1395_v18 = vsel %vm278_vm0, 0.0, %v264_v14  ;;  %v292_v19 = vsel %vm278_vm0, %v264_v14, 0.0  ;;  %s1207_s23 = smov 48   ;;  %s1208_s30 = smov 56  }
  0x59   : > { %v1380_v8 = vsel %vm313_vm1, %v314_v4, %v315_v5  ;;  %v1388_v12 = vsel %vm362_vm2, %v363_v6, %v364_v7  ;;  %v317_v20 = vrot.slane %v1391_v16, 1  ;;  %v318_v21 = vrot.slane %v289_v17, 1  ;;  %v249_v4 = vld [vmem:[%s1363_s10 + $0x30] sm:$0xff]  ;;  %s1209_s4 = smov 64   ;;  %p234_p7 = scmp.lt.s32.totalorder %s1187_s15, 1 }
  0x5a   : > { %338 = vrot.lane.b32.xlu0 %v1380_v8, %s1202_s19  ;;  %v326_v22 = vrot.slane %v1395_v18, 1  ;;  %v327_v23 = vrot.slane %v292_v19, 1  ;;  %v1403_v24 = vsel %vm278_vm0, 0.0, %v265_v15  ;;  %v293_v25 = vsel %vm278_vm0, %v265_v15, 0.0  ;;  %v654_v37 = vld [vmem:[#allocation5 + $0x10] sm:$0xff] }
  0x5b   : > { %v366_v26 = vrot.slane %v1391_v16, 2  ;;  %v367_v27 = vrot.slane %v289_v17, 2  ;;  %v319_v28 = vsel %vm313_vm1, %v317_v20, %v318_v21  ;;  %v329_v30 = vrot.slane %v1403_v24, 1  ;;  %s1757_s15 = smov (!%p234_p7, %s1187_s15), 1 }
  0x5c   : > { %v1409_v29 = vsel %vm313_vm1, %v326_v22, %v327_v23  ;;  %v330_v31 = vrot.slane %v293_v25, 1  ;;  %340 = vrot.lane.b32.xlu1 %v319_v28, %s1202_s19  ;;  %v375_v33 = vrot.slane %v1395_v18, 2  ;;  %v376_v34 = vrot.slane %v292_v19, 2  ;;  %s932_s5 = sshll.u32 %s1757_s15, 6 }
  0x5d   : > { %v368_v35 = vsel %vm362_vm2, %v366_v26, %v367_v27  ;;  %v378_v39 = vrot.slane %v1403_v24, 2  ;;  %v379_v40 = vrot.slane %v293_v25, 2  ;;  %v1437_v44 = vsel %vm278_vm0, 0.0, %v262_v41  ;;  %s238_s24 = scalar_lea.vmem %s1736_s3, %s932_s5 }
  0x5e   : > { %387 = vrot.lane.b32.xlu0 %v1388_v12, %s1203_s20  ;;  %v1416_v32 = vsel %vm313_vm1, %v329_v30, %v330_v31  ;;  %v1426_v38 = vsel %vm362_vm2, %v375_v33, %v376_v34  ;;  %v1441_v46 = vsel %vm278_vm0, 0.0, %v268_v42  ;;  %v296_v47 = vsel %vm278_vm0, %v268_v42, 0.0  ;;  %v652_v34 = vld [vmem:[#allocation5] sm:$0xff]  ;;  %v657_v42 = vld [vmem:[#allocation5 + $0x28] sm:$0xff] }
  0x5f   : > { %v1434_v43 = vsel %vm362_vm2, %v378_v39, %v379_v40  ;;  %v290_v48 = vsel %vm278_vm0, %v262_v41, 0.0  ;;  %v437_v49 = vrot.slane %v1441_v46, 1  ;;  %v438_v50 = vrot.slane %v296_v47, 1  ;;  %v655_v39 = vld [vmem:[#allocation5 + $0x18] sm:$0xff]  ;;  %v656_v41 = vld [vmem:[#allocation5 + $0x20] sm:$0xff] }
  0x60   : > { %348 = vrot.lane.b32.xlu1 %v1416_v32, %s1202_s19  ;;  %v464_v51 = vrot.slane %v1441_v46, 2  ;;  %v465_v52 = vrot.slane %v296_v47, 2  ;;  %v266_v53 = vrot.slane %v248_v45, 7  ;;  %v320_v55 = vrot.slane %v1437_v44, 1  ;;  %v658_v47 = vld [vmem:[#allocation5 + $0x30] sm:$0xff] }
  0x61   : > { %v1452_v54 = vsel %vm313_vm1, %v437_v49, %v438_v50  ;;  %v321_v56 = vrot.slane %v290_v48, 1  ;;  %v263_v62 = vrot.slane %v245_v58, 7  ;;  %v267_v9 = vrot.slane %v249_v4, 7  ;;  %v660_v50 = vld [vmem:[#allocation5 + $0x40] sm:$0xff] }
  0x62   : > { %346 = vrot.lane.b32.xlu0 %v1409_v29, %s1202_s19  ;;  %v1456_v57 = vsel %vm362_vm2, %v464_v51, %v465_v52  ;;  %v1463_v59 = vsel %vm278_vm0, 0.0, %v266_v53  ;;  %v294_v61 = vsel %vm278_vm0, %v266_v53, 0.0  ;;  %v369_v10 = vrot.slane %v1437_v44, 2 }
  0x63   : > { %v322_v60 = vsel %vm313_vm1, %v320_v55, %v321_v56  ;;  %v332_v63 = vrot.slane %v1463_v59, 1  ;;  %v333_v0 = vrot.slane %v294_v61, 1  ;;  %v1472_v1 = vsel %vm278_vm0, 0.0, %v263_v62 }
  0x64   : > { %395 = vrot.lane.b32.xlu1 %v1426_v38, %s1203_s20  ;;  %v291_v3 = vsel %vm278_vm0, %v263_v62, 0.0  ;;  %v323_v6 = vrot.slane %v1472_v1, 1  ;;  %v370_v13 = vrot.slane %v290_v48, 2  ;;  %v1486_v14 = vsel %vm278_vm0, 0.0, %v267_v9  ;;  %v659_v48 = vld [vmem:[#allocation5 + $0x38] sm:$0xff] }
  0x65   : > { %v334_v5 = vsel %vm313_vm1, %v332_v63, %v333_v0  ;;  %v324_v7 = vrot.slane %v291_v3, 1  ;;  %v295_v15 = vsel %vm278_vm0, %v267_v9, 0.0  ;;  %v335_v17 = vrot.slane %v1486_v14, 1 }
  0x66   : > { %389 = vrot.lane.b32.xlu0 %v368_v35, %s1203_s20  ;;  %v336_v19 = vrot.slane %v295_v15, 1  ;;  %v371_v20 = vsel %vm362_vm2, %v369_v10, %v370_v13  ;;  %v381_v22 = vrot.slane %v1463_v59, 2  ;;  %v382_v23 = vrot.slane %v294_v61, 2 }
  0x67   : > { %v325_v11 = vsel %vm313_vm1, %v323_v6, %v324_v7  ;;  %v372_v26 = vrot.slane %v1472_v1, 2  ;;  %v373_v27 = vrot.slane %v291_v3, 2  ;;  %v384_v30 = vrot.slane %v1486_v14, 2 }
  0x68   : > { %397 = vrot.lane.b32.xlu1 %v1434_v43, %s1203_s20  ;;  %v337_v21 = vsel %vm313_vm1, %v335_v17, %v336_v19  ;;  %v383_v25 = vsel %vm362_vm2, %v381_v22, %v382_v23  ;;  %v385_v31 = vrot.slane %v295_v15, 2  ;;  %v984_v40 = vpack.c.bf16 %v655_v39, %v654_v37 }
  0x69   : > { %v988_v45 = vpack.c.bf16 %v657_v42, %v656_v41  ;;  %v992_v49 = vpack.c.bf16 %v659_v48, %v658_v47  ;;  %vm563_vm3 = vcmask 64512   ;;  %vm572_vm4 = vcmask 130048  }
  0x6a   : > { %412 = vrot.lane.b32.xlu0 %v1391_v16, %s1204_s21  ;;  %v386_v33 = vsel %vm362_vm2, %v384_v30, %v385_v31  ;;  %vm581_vm5 = vcmask 195584   ;;  %vm590_vm6 = vcmask 261120   ;;  %vm599_vm7 = vcmask 326656  }
  0x6b   : > { %vm608_vm8 = vcmask 392192   ;;  %vm617_vm9 = vcmask 457728   ;;  %vm626_vm10 = vcmask 523264   ;;  %vm635_vm11 = vcmask 588800  }
  0x6c   : > { %420 = vrot.lane.b32.xlu1 %v1403_v24, %s1204_s21 }
  0x6e   : > { %414 = vrot.lane.b32.xlu0 %v1437_v44, %s1204_s21 }
  0x70   : > { %422 = vrot.lane.b32.xlu1 %v1463_v59, %s1204_s21 }
  0x72   : > { %440 = vrot.lane.b32.xlu0 %v319_v28, %s1205_s7  ;;  %v374_v28 = vsel %vm362_vm2, %v372_v26, %v373_v27 }
  0x74   : > { %448 = vrot.lane.b32.xlu1 %v1416_v32, %s1205_s7 }
  0x76   : > { %342 = vrot.lane.b32.xlu0 %v322_v60, %s1202_s19 }
  0x78   : > { %350 = vrot.lane.b32.xlu1 %v334_v5, %s1202_s19 }
  0x7a   : > { %442 = vrot.lane.b32.xlu0 %v322_v60, %s1205_s7 }
  0x7c   : > { %450 = vrot.lane.b32.xlu1 %v334_v5, %s1205_s7 }
  0x7e   : > { %467 = vrot.lane.b32.xlu0 %v368_v35, %s1206_s8  ;;  %v653_v35 = vld [vmem:[#allocation5 + $0x8] sm:$0xff] }
  0x7f   : > { %v980_v36 = vpack.c.bf16 %v653_v35, %v652_v34 }
  0x80   : > { %475 = vrot.lane.b32.xlu1 %v1434_v43, %s1206_s8 }
  0x81   : > { %981 = vmatprep.subr.bf16.mxu0 %v980_v36  ;;  %996 = vmatprep.subr.bf16.mxu1 %v980_v36 }
  0x82   : > { %344 = vrot.lane.b32.xlu0 %v325_v11, %s1202_s19  ;;  %983 = vmatpush3.bf16.msra.mxu0 %v980_v36 }
  0x83   : > { %1001 = vmatpush3.bf16.msra.mxu1 %v980_v36  ;;  %985 = vmatprep.subr.bf16.mxu0 %v984_v40 }
  0x84   : > { %352 = vrot.lane.b32.xlu1 %v337_v21, %s1202_s19  ;;  %997 = vmatprep.subr.bf16.mxu1 %v984_v40 }
  0x86   : > { %391 = vrot.lane.b32.xlu0 %v371_v20, %s1203_s20  ;;  %987 = vmatpush3.bf16.msra.mxu0 %v984_v40 }
  0x87   : > { %1002 = vmatpush3.bf16.msra.mxu1 %v984_v40  ;;  %989 = vmatprep.subr.bf16.mxu0 %v988_v45 }
  0x88   : > { %399 = vrot.lane.b32.xlu1 %v383_v25, %s1203_s20  ;;  %998 = vmatprep.subr.bf16.mxu1 %v988_v45 }
  0x8a   : > { %469 = vrot.lane.b32.xlu0 %v371_v20, %s1206_s8  ;;  %991 = vmatpush3.bf16.msra.mxu0 %v988_v45 }
  0x8b   : > { %1003 = vmatpush3.bf16.msra.mxu1 %v988_v45  ;;  %993 = vmatprep.subr.bf16.mxu0 %v992_v49 }
  0x8c   : > { %477 = vrot.lane.b32.xlu1 %v383_v25, %s1206_s8  ;;  %999 = vmatprep.subr.bf16.mxu1 %v992_v49 }
  0x8e   : > { %491 = vrot.lane.b32.xlu0 %v1437_v44, %s1207_s23  ;;  %995 = vmatpush3.bf16.msra.mxu0 %v992_v49 }
  0x8f   : > { %1004 = vmatpush3.bf16.msra.mxu1 %v992_v49  ;;  %966 = vmatprep.subr.mxu0 %v660_v50 }
  0x90   : > { %499 = vrot.lane.b32.xlu1 %v1463_v59, %s1207_s23  ;;  %1000 = vmatprep.subr.mxu1 %v660_v50 }
  0x92   : > { %393 = vrot.lane.b32.xlu0 %v374_v28, %s1203_s20  ;;  %967 = vmatpush3.msra.mxu0 %v660_v50 }
  0x93   : > { %1005 = vmatpush3.msra.mxu1 %v660_v50 }
  0x94   : > { %401 = vrot.lane.b32.xlu1 %v386_v33, %s1203_s20 }
  0x96   : > { %416 = vrot.lane.b32.xlu0 %v1472_v1, %s1204_s21 }
  0x98   : > { %424 = vrot.lane.b32.xlu1 %v1486_v14, %s1204_s21 }
  0x9a   : > { %493 = vrot.lane.b32.xlu0 %v1472_v1, %s1207_s23 }
  0x9c   : > { %501 = vrot.lane.b32.xlu1 %v1486_v14, %s1207_s23 }
  0x9e   : > { %515 = vrot.lane.b32.xlu0 %v322_v60, %s1208_s30 }
  0xa0   : > { %523 = vrot.lane.b32.xlu1 %v334_v5, %s1208_s30 }
  0xa2   : > { %418 = vrot.lane.b32.xlu0 %v1395_v18, %s1204_s21 }
  0xa4   : > { %426 = vrot.lane.b32.xlu1 %v1441_v46, %s1204_s21 }
  0xa6   : > { %444 = vrot.lane.b32.xlu0 %v325_v11, %s1205_s7 }
  0xa8   : > { %452 = vrot.lane.b32.xlu1 %v337_v21, %s1205_s7 }
  0xaa   : > { %517 = vrot.lane.b32.xlu0 %v325_v11, %s1208_s30 }
  0xac   : > { %525 = vrot.lane.b32.xlu1 %v337_v21, %s1208_s30 }
  0xae   : > { %539 = vrot.lane.b32.xlu0 %v371_v20, %s1209_s4 }
  0xb0   : > { %547 = vrot.lane.b32.xlu1 %v383_v25, %s1209_s4 }
  0xb2   : > { %446 = vrot.lane.b32.xlu0 %v1409_v29, %s1205_s7 }
  0xb4   : > { %454 = vrot.lane.b32.xlu1 %v1452_v54, %s1205_s7 }
  0xb6   : > { %471 = vrot.lane.b32.xlu0 %v374_v28, %s1206_s8 }
  0xb8   : > { %479 = vrot.lane.b32.xlu1 %v386_v33, %s1206_s8 }
  0xba   : > { %541 = vrot.lane.b32.xlu0 %v374_v28, %s1209_s4 }
  0xbc   : > { %549 = vrot.lane.b32.xlu1 %v386_v33, %s1209_s4 }
  0xbe   : > { %473 = vrot.lane.b32.xlu0 %v1426_v38, %s1206_s8 }
  0xc0   : > { %481 = vrot.lane.b32.xlu1 %v1456_v57, %s1206_s8 }
  0xc2   : > { %495 = vrot.lane.b32.xlu0 %v1395_v18, %s1207_s23 }
  0xc4   : > { %503 = vrot.lane.b32.xlu1 %v1441_v46, %s1207_s23 }
  0xc6   : > { %497 = vrot.lane.b32.xlu0 %v1403_v24, %s1207_s23 }
  0xc8   : > { %505 = vrot.lane.b32.xlu1 %v1374_v2, %s1207_s23 }
  0xca   : > { %519 = vrot.lane.b32.xlu0 %v1409_v29, %s1208_s30 }
  0xcc   : > { %v339_v51 = vpop.permute.xlu0 %338  ;;  %527 = vrot.lane.b32.xlu1 %v1452_v54, %s1208_s30 }
  0xcd   : > { %v564_v52 = vsel %vm563_vm3, %v1374_v2, %v339_v51 }
  0xce   : > { %521 = vrot.lane.b32.xlu0 %v1416_v32, %s1208_s30  ;;  %v341_v29 = vpop.permute.xlu1 %340 }
  0xcf   : > { %v565_v32 = vsel %vm563_vm3, %v1391_v16, %v341_v29 }
  0xd0   : > { %v388_v53 = vpop.permute.xlu0 %387  ;;  %529 = vrot.lane.b32.xlu1 %v1380_v8, %s1208_s30 }
  0xd1   : > { %v573_v55 = vsel %vm572_vm4, %v564_v52, %v388_v53 }
  0xd2   : > { %543 = vrot.lane.b32.xlu0 %v1426_v38, %s1209_s4  ;;  %v349_v2 = vpop.permute.xlu1 %348 }
  0xd4   : > { %v347_v46 = vpop.permute.xlu0 %346  ;;  %551 = vrot.lane.b32.xlu1 %v1456_v57, %s1209_s4 }
  0xd5   : > { %v568_v58 = vsel %vm563_vm3, %v1395_v18, %v347_v46 }
  0xd6   : > { %545 = vrot.lane.b32.xlu0 %v1434_v43, %s1209_s4  ;;  %v396_v38 = vpop.permute.xlu1 %395  ;;  %v569_v43 = vsel %vm563_vm3, %v1403_v24, %v349_v2 }
  0xd7   : > { %v577_v60 = vsel %vm572_vm4, %v568_v58, %v396_v38 }
  0xd8   : > { %v390_v56 = vpop.permute.xlu0 %389  ;;  %553 = vrot.lane.b32.xlu1 %v1388_v12, %s1209_s4 }
  0xd9   : > { %v574_v54 = vsel %vm572_vm4, %v565_v32, %v390_v56 }
  0xda   : > { %v398_v16 = vpop.permute.xlu1 %397 }
  0xdb   : > { %v578_v61 = vsel %vm572_vm4, %v569_v43, %v398_v16 }
  0xdc   : > { %v413_v8 = vpop.permute.xlu0 %412 }
  0xdd   : > { %v582_v39 = vsel %vm581_vm5, %v573_v55, %v413_v8 }
  0xde   : > { %v421_v63 = vpop.permute.xlu1 %420 }
  0xdf   : > { %v586_v51 = vsel %vm581_vm5, %v577_v60, %v421_v63 }
  0xe0   : > { %v415_v18 = vpop.permute.xlu0 %414 }
  0xe1   : > { %v583_v62 = vsel %vm581_vm5, %v574_v54, %v415_v18 }
  0xe2   : > { %v423_v57 = vpop.permute.xlu1 %422 }
  0xe3   : > { %v1583_v3 = vsel %vm581_vm5, %v578_v61, %v423_v57 }
  0xe4   : > { %v441_v0 = vpop.permute.xlu0 %440 }
  0xe5   : > { %v591_v41 = vsel %vm590_vm6, %v582_v39, %v441_v0 }
  0xe6   : > { %v449_v5 = vpop.permute.xlu1 %448 }
  0xe7   : > { %v595_v53 = vsel %vm590_vm6, %v586_v51, %v449_v5 }
  0xe8   : > { %v343_v4 = vpop.permute.xlu0 %342 }
  0xe9   : > { %v566_v11 = vsel %vm563_vm3, %v1437_v44, %v343_v4 }
  0xea   : > { %v351_v12 = vpop.permute.xlu1 %350 }
  0xeb   : > { %v570_v20 = vsel %vm563_vm3, %v1463_v59, %v351_v12 }
  0xec   : > { %v443_v6 = vpop.permute.xlu0 %442 }
  0xed   : > { %v592_v54 = vsel %vm590_vm6, %v583_v62, %v443_v6 }
  0xee   : > { %v1585_v9 = vpop.permute.xlu1 %450 }
  0xef   : > { %v596_v62 = vsel %vm590_vm6, %v1583_v3, %v1585_v9 }
  0xf0   : > { %v468_v7 = vpop.permute.xlu0 %467 }
  0xf1   : > { %v600_v42 = vsel %vm599_vm7, %v591_v41, %v468_v7 }
  0xf2   : > { %v476_v10 = vpop.permute.xlu1 %475 }
  0xf3   : > { %v604_v29 = vsel %vm599_vm7, %v595_v53, %v476_v10 }
  0xf4   : > { %v1587_v24 = vpop.permute.xlu0 %344 }
  0xf6   : > { %v1594_v17 = vpop.permute.xlu1 %352 }
  0xf8   : > { %v392_v13 = vpop.permute.xlu0 %391 }
  0xf9   : > { %v1592_v15 = vsel %vm572_vm4, %v566_v11, %v392_v13 }
  0xfa   : > { %v400_v21 = vpop.permute.xlu1 %399 }
  0xfb   : > { %v1599_v22 = vsel %vm572_vm4, %v570_v20, %v400_v21 }
  0xfc   : > { %v470_v19 = vpop.permute.xlu0 %469 }
  0xfd   : > { %v601_v60 = vsel %vm599_vm7, %v592_v54, %v470_v19  ;;  %v920_v54 = vld [vmem:[%s1735_s2] ss:$0 sm:$0xff] }
  0xfe   : > { %v478_v25 = vpop.permute.xlu1 %477 }
  0xff   : > { %v605_v4 = vsel %vm599_vm7, %v596_v62, %v478_v25 }
 0x100   : > { %v492_v23 = vpop.permute.xlu0 %491 }
 0x101   : > { %v609_v45 = vsel %vm608_vm8, %v600_v42, %v492_v23 }
 0x102   : > { %v500_v27 = vpop.permute.xlu1 %499 }
 0x103   : > { %v613_v46 = vsel %vm608_vm8, %v604_v29, %v500_v27 }
 0x104   : > { %v1601_v26 = vpop.permute.xlu0 %393 }
 0x106   : > { %v1605_v28 = vpop.permute.xlu1 %401 }
 0x108   : > { %v1603_v44 = vpop.permute.xlu0 %416 }
 0x109   : > { %v584_v23 = vsel %vm581_vm5, %v1592_v15, %v1603_v44 }
 0x10a   : > { %v1607_v31 = vpop.permute.xlu1 %424 }
 0x10c   : > { %v494_v30 = vpop.permute.xlu0 %493 }
 0x10d   : > { %v610_v8 = vsel %vm608_vm8, %v601_v60, %v494_v30  ;;  %v567_v30 = vsel %vm563_vm3, %v1472_v1, %v1587_v24  ;;  %v588_v24 = vsel %vm581_vm5, %v1599_v22, %v1607_v31 }
 0x10e   : > { %v502_v34 = vpop.permute.xlu1 %501 }
 0x10f   : > { %v614_v5 = vsel %vm608_vm8, %v605_v4, %v502_v34  ;;  %v576_v34 = vsel %vm572_vm4, %v567_v30, %v1601_v26 }
 0x110   : > { %v516_v33 = vpop.permute.xlu0 %515 }
 0x111   : > { %v618_v48 = vsel %vm617_vm9, %v609_v45, %v516_v33 }
 0x112   : > { %v524_v59 = vpop.permute.xlu1 %523 }
 0x113   : > { %v622_v2 = vsel %vm617_vm9, %v613_v46, %v524_v59 }
 0x114   : > { %v1609_v35 = vpop.permute.xlu0 %418 }
 0x116   : > { %v1613_v37 = vpop.permute.xlu1 %426 }
 0x118   : > { %v1611_v36 = vpop.permute.xlu0 %444 }
 0x119   : > { %v593_v27 = vsel %vm590_vm6, %v584_v23, %v1611_v36 }
 0x11a   : > { %v1619_v47 = vpop.permute.xlu1 %452 }
 0x11c   : > { %v518_v40 = vpop.permute.xlu0 %517 }
 0x11d   : > { %v619_v16 = vsel %vm617_vm9, %v610_v8, %v518_v40  ;;  %v585_v40 = vsel %vm581_vm5, %v576_v34, %v1609_v35  ;;  %v597_v35 = vsel %vm590_vm6, %v588_v24, %v1619_v47 }
 0x11e   : > { %v526_v52 = vpop.permute.xlu1 %525 }
 0x11f   : > { %v623_v6 = vsel %vm617_vm9, %v614_v5, %v526_v52 }
 0x120   : > { %v540_v49 = vpop.permute.xlu0 %539 }
 0x121   : > { %v627_v50 = vsel %vm626_vm10, %v618_v48, %v540_v49  ;;  %v571_v49 = vsel %vm563_vm3, %v1486_v14, %v1594_v17 }
 0x122   : > { %636 = vst.msk [vmem:[#allocation2] sm:$0xff] %vm635_vm11, %v627_v50  ;;  %v548_v32 = vpop.permute.xlu1 %547  ;;  %v580_v22 = vsel %vm572_vm4, %v571_v49, %v1605_v28 }
 0x123   : > { %v631_v56 = vsel %vm626_vm10, %v622_v2, %v548_v32  ;;  %v589_v47 = vsel %vm581_vm5, %v580_v22, %v1613_v37 }
 0x124   : > { %v447_v55 = vpop.permute.xlu0 %446  ;;  %640 = vst.msk [vmem:[#allocation2 + $0x20] sm:$0xff] %vm635_vm11, %v631_v56 }
 0x125   : > { %v594_v36 = vsel %vm590_vm6, %v585_v40, %v447_v55 }
 0x126   : > { %v455_v43 = vpop.permute.xlu1 %454 }
 0x127   : > { %v598_v55 = vsel %vm590_vm6, %v589_v47, %v455_v43 }
 0x128   : > { %v472_v58 = vpop.permute.xlu0 %471 }
 0x129   : > { %v644_v38 = vld [vmem:[#allocation2] sm:$0xff]  ;;  %v602_v33 = vsel %vm599_vm7, %v593_v27, %v472_v58 }
 0x12a   : > { %968 = vmatprep.mubr.msk.f32.mxu0 %vm635_vm11, %v644_v38  ;;  %v480_v63 = vpop.permute.xlu1 %479 }
 0x12b   : > { %v648_v57 = vld [vmem:[#allocation2 + $0x20] sm:$0xff]  ;;  %v606_v50 = vsel %vm599_vm7, %v597_v35, %v480_v63 }
 0x12c   : > { %v542_v61 = vpop.permute.xlu0 %541  ;;  %974 = vmatprep.mubr.msk.f32.mxu1 %vm635_vm11, %v648_v57 }
 0x12d   : > { %v628_v18 = vsel %vm626_vm10, %v619_v16, %v542_v61 }
 0x12e   : > { %637 = vst.msk [vmem:[#allocation2 + $0x8] sm:$0xff] %vm635_vm11, %v628_v18  ;;  %v550_v12 = vpop.permute.xlu1 %549 }
 0x12f   : > { %v632_v7 = vsel %vm626_vm10, %v623_v6, %v550_v12 }
 0x130   : > { %v474_v0 = vpop.permute.xlu0 %473  ;;  %641 = vst.msk [vmem:[#allocation2 + $0x28] sm:$0xff] %vm635_vm11, %v632_v7 }
 0x131   : > { %v603_v1 = vsel %vm599_vm7, %v594_v36, %v474_v0 }
 0x132   : > { %v482_v3 = vpop.permute.xlu1 %481 }
 0x133   : > { %v607_v17 = vsel %vm599_vm7, %v598_v55, %v482_v3 }
 0x134   : > { %v496_v10 = vpop.permute.xlu0 %495 }
 0x135   : > { %v645_v11 = vld [vmem:[#allocation2 + $0x8] sm:$0xff]  ;;  %v611_v59 = vsel %vm608_vm8, %v602_v33, %v496_v10 }
 0x136   : > { %969 = vmatmul.mubr.msk.f32.vlgmr.msra.gmra.mrb[0].mxu0 %vm635_vm11, %v645_v11  ;;  %v504_v13 = vpop.permute.xlu1 %503 }
 0x137   : > { %v649_v20 = vld [vmem:[#allocation2 + $0x28] sm:$0xff]  ;;  %v615_v31 = vsel %vm608_vm8, %v606_v50, %v504_v13 }
 0x138   : > { %v498_v9 = vpop.permute.xlu0 %497  ;;  %975 = vmatmul.mubr.msk.f32.vlgmr.msra.gmra.mrb[0].mxu1 %vm635_vm11, %v649_v20 }
 0x139   : > { %v612_v26 = vsel %vm608_vm8, %v603_v1, %v498_v9 }
 0x13a   : > { %v506_v21 = vpop.permute.xlu1 %505 }
 0x13b   : > { %v616_v29 = vsel %vm608_vm8, %v607_v17, %v506_v21 }
 0x13c   : > { %v520_v19 = vpop.permute.xlu0 %519 }
 0x13d   : > { %v620_v15 = vsel %vm617_vm9, %v611_v59, %v520_v19 }
 0x13e   : > { %v528_v39 = vpop.permute.xlu1 %527 }
 0x13f   : > { %v624_v52 = vsel %vm617_vm9, %v615_v31, %v528_v39 }
 0x140   : > { %v522_v25 = vpop.permute.xlu0 %521 }
 0x141   : > { %v621_v45 = vsel %vm617_vm9, %v612_v26, %v522_v25 }
 0x142   : > { %v530_v42 = vpop.permute.xlu1 %529 }
 0x143   : > { %v625_v37 = vsel %vm617_vm9, %v616_v29, %v530_v42 }
 0x144   : > { %v544_v44 = vpop.permute.xlu0 %543 }
 0x145   : > { %v629_v41 = vsel %vm626_vm10, %v620_v15, %v544_v44 }
 0x146   : > { %638 = vst.msk [vmem:[#allocation2 + $0x10] sm:$0xff] %vm635_vm11, %v629_v41  ;;  %v552_v53 = vpop.permute.xlu1 %551 }
 0x147   : > { %v633_v14 = vsel %vm626_vm10, %v624_v52, %v552_v53 }
 0x148   : > { %v546_v48 = vpop.permute.xlu0 %545  ;;  %642 = vst.msk [vmem:[#allocation2 + $0x30] sm:$0xff] %vm635_vm11, %v633_v14 }
 0x149   : > { %v630_v51 = vsel %vm626_vm10, %v621_v45, %v546_v48 }
 0x14a   : > { %639 = vst.msk [vmem:[#allocation2 + $0x18] sm:$0xff] %vm635_vm11, %v630_v51  ;;  %v554_v46 = vpop.permute.xlu1 %553 }
 0x14b   : > { %v634_v2 = vsel %vm626_vm10, %v625_v37, %v554_v46 }
 0x14c   : > { %643 = vst.msk [vmem:[#allocation2 + $0x38] sm:$0xff] %vm635_vm11, %v634_v2 }
 0x14d   : > { %v646_v28 = vld [vmem:[#allocation2 + $0x10] sm:$0xff] }
 0x14e   : > { %971 = vmatprep.mubr.msk.f32.mxu0 %vm635_vm11, %v646_v28 }
 0x14f   : > { %v650_v56 = vld [vmem:[#allocation2 + $0x30] sm:$0xff] }
 0x150   : > { %977 = vmatprep.mubr.msk.f32.mxu1 %vm635_vm11, %v650_v56 }
 0x151   : > { %v647_v32 = vld [vmem:[#allocation2 + $0x18] sm:$0xff] }
 0x152   : > { %972 = vmatmul.mubr.msk.f32.gmra.mrb[2].mxu0 %vm635_vm11, %v647_v32 }
 0x153   : > { %v651_v58 = vld [vmem:[#allocation2 + $0x38] sm:$0xff] }
 0x154   : > { %978 = vmatmul.mubr.msk.f32.gmra.mrb[2].mxu1 %vm635_vm11, %v651_v58 }
 0x209   : > { %v970_v38 = vpop.f32.mrb[0].mxu0 }
 0x20a   : > { %v765_v60 = vadd.f32 %v970_v38, %v920_v54  ;;  %v759_v8 = vpop.f32.mrb[1].mxu0 }
 0x20b   : > { %v760_v43 = vadd.f32 %v920_v54, %v759_v8  ;;  %v976_v16 = vpop.f32.mrb[0].mxu1 }
 0x20c   : > { %800 = vst.msk [vmem:[%s238_s24 + $0x8] sm:$0xff] %vm572_vm4, %v765_v60  ;;  %v785_v61 = vadd.f32 %v976_v16, %v920_v54  ;;  %v779_v18 = vpop.f32.mrb[1].mxu1 }
 0x20d   : > { %799 = vst.msk [vmem:[%s238_s24] sm:$0xff] %vm572_vm4, %v760_v43  ;;  %v780_v63 = vadd.f32 %v920_v54, %v779_v18 }
 0x20e   : > { %804 = vst.msk [vmem:[%s238_s24 + $0x28] sm:$0xff] %vm572_vm4, %v785_v61 }
 0x20f   : > { %803 = vst.msk [vmem:[%s238_s24 + $0x20] sm:$0xff] %vm572_vm4, %v780_v63 }
 0x225   : > { %v973_v62 = vpop.f32.mrb[2].mxu0 }
 0x226   : > { %v775_v0 = vadd.f32 %v973_v62, %v920_v54  ;;  %v769_v57 = vpop.f32.mrb[3].mxu0 }
 0x227   : > { %v770_v4 = vadd.f32 %v920_v54, %v769_v57  ;;  %v979_v5 = vpop.f32.mrb[2].mxu1 }
 0x228   : > { %802 = vst.msk [vmem:[%s238_s24 + $0x18] sm:$0xff] %vm572_vm4, %v775_v0  ;;  %v795_v6 = vadd.f32 %v979_v5, %v920_v54  ;;  %v789_v12 = vpop.f32.mrb[3].mxu1 }
 0x229   : > { %801 = vst.msk [vmem:[%s238_s24 + $0x10] sm:$0xff] %vm572_vm4, %v770_v4  ;;  %v790_v7 = vadd.f32 %v920_v54, %v789_v12 }
 0x22a   : > { %806 = vst.msk [vmem:[%s238_s24 + $0x38] sm:$0xff] %vm572_vm4, %v795_v6 }
 0x22b   : > { %805 = vst.msk [vmem:[%s238_s24 + $0x30] sm:$0xff] %vm572_vm4, %v790_v7 }
 0x22c PF: > { %s17_s17 = sadd.s32 1, %s1195_s17   ;;  %s1749_s12 = smov %s1179_s13 }
 0x22d   : > { %p14_p1 = scmp.ge.s32.totalorder %s17_s17, 4   ;;  %s1750_s13 = smov %s1183_s14 }
 0x22e   : > { %s1751_s14 = smov %s1316_s26  ;;  %s1752_s15 = smov %s1191_s16 }
 0x22f   : > { %s1753_s16 = smov %s1755_s25  ;;  %16 = sbr.rel (!%p14_p1) target bundleno = 5 (0x5), region = 84 }
 0x236   :  { %828 = vsyncpa [#allocation4], 1 }
 0x237   :  { %830 = vsyncpa [#allocation4 + $0x1], 1 }
 0x238   :  { %831 = vsyncpa [#allocation6], 1 }

</bundles_post_ra>
